<compile_context>
chip_gen: v5e
topology: v5e:2x2
jax: 0.10.0
libtpu: 0.0.40
codegen_flags: <defaults>
</compile_context>

<pallas_src>
import functools

import jax
import jax.numpy as jnp
from jax.experimental import pallas as pl
from jax.experimental.pallas import tpu as pltpu  # noqa: F401  (TPU backend)

D_HID = 16
N_EXPERTS = 8
BATCH = 4


def _round_up(n, m):
    return ((n + m - 1) // m) * m


def _moe_kernel(x_ref, slab_ref, o_ref, *, d, d_out, b1_off, w2_off, b2_off):
    # Slab layout (rows, all starts 8-aligned where it matters):
    #   [0      : d      )  W1_fused  (d, d_out)   = pre_proc ∘ stacked net1
    #   [b1_off : b1_off+1)  b1_fused (1, d_out)
    #   [w2_off : w2_off+d_out)  W2 block-diagonal (d_out, d_out)
    #   [b2_off : b2_off+1)  b2       (1, d_out)
    w1 = slab_ref[pl.ds(0, d), :]
    b1 = slab_ref[pl.ds(b1_off, 1), :]
    w2 = slab_ref[pl.ds(w2_off, d_out), :]
    b2 = slab_ref[pl.ds(b2_off, 1), :]

    x = x_ref[...]
    # fused pre_proc + all experts' net1, then ReLU
    h = jnp.dot(x, w1, preferred_element_type=jnp.float32) + b1
    h = jnp.maximum(h, 0.0)
    # all experts' net2 as one block-diagonal matmul (== concat over experts)
    out = jnp.dot(h, w2, preferred_element_type=jnp.float32) + b2
    o_ref[...] = out.astype(o_ref.dtype)


def pack_moe_params(params, n_experts):
    """Fold pre_proc into net1, stack experts, build one lane-dense slab.

    params:
      pre_proc_w (d,d), pre_proc_b (d,)           -- torch Linear layout (out,in)
      net1_w (E,d,d), net1_b (E,d)
      net2_w (E,d,d), net2_b (E,d)
    """
    d = params["pre_proc_w"].shape[0]
    d_out = d * n_experts

    # Stacked net1: W1_all[in, e*d + out] = net1_w[e, out, in]  -> (d, d_out)
    w1_all = jnp.transpose(params["net1_w"], (2, 0, 1)).reshape(d, d_out)
    b1_all = params["net1_b"].reshape(d_out)

    # Fuse pre_proc (no nonlinearity between pre_proc and net1):
    #   net1(pre_proc(x)) = x @ (Wp^T @ W1_all) + (bp @ W1_all + b1_all)
    wp_t = params["pre_proc_w"].T                      # (d, d)
    w1_fused = wp_t @ w1_all                           # (d, d_out)
    b1_fused = params["pre_proc_b"] @ w1_all + b1_all  # (d_out,)

    # Block-diagonal net2: out[:, e*d:(e+1)*d] = h[:, e*d:(e+1)*d] @ net2_w[e].T
    w2_bd = jnp.zeros((d_out, d_out), jnp.float32)
    for e in range(n_experts):
        w2_bd = w2_bd.at[e * d:(e + 1) * d, e * d:(e + 1) * d].set(
            params["net2_w"][e].T)
    b2_all = params["net2_b"].reshape(d_out)

    # Pack everything into one (rows, d_out) slab with 8-aligned section starts.
    b1_off = d
    w2_off = _round_up(d + 1, 8)
    b2_off = w2_off + d_out
    rows = _round_up(b2_off + 1, 8)

    slab = jnp.zeros((rows, d_out), jnp.float32)
    slab = slab.at[0:d, :].set(w1_fused)
    slab = slab.at[b1_off, :].set(b1_fused)
    slab = slab.at[w2_off:w2_off + d_out, :].set(w2_bd)
    slab = slab.at[b2_off, :].set(b2_all)
    return slab, dict(d=d, d_out=d_out, b1_off=b1_off, w2_off=w2_off,
                      b2_off=b2_off)


def moe_forward(x, slab, meta):
    B, d = x.shape
    d_out = meta["d_out"]
    rows = slab.shape[0]

    kernel = functools.partial(_moe_kernel, d=d, d_out=d_out,
                               b1_off=meta["b1_off"], w2_off=meta["w2_off"],
                               b2_off=meta["b2_off"])

    full = lambda shape: pl.BlockSpec(shape, lambda: (0,) * len(shape))
    return pl.pallas_call(
        kernel,
        out_shape=jax.ShapeDtypeStruct((B, d_out), jnp.float32),
        grid=(),
        in_specs=[
            full((B, d)),        # activations
            full((rows, d_out)),  # single packed weight/bias slab (1 DMA)
        ],
        out_specs=full((B, d_out)),
    )(x, slab)


def _reference(x, params, n_experts):
    """Pure-JAX mirror of the torch MoE forward (no fusion, no packing)."""
    h = x @ params["pre_proc_w"].T + params["pre_proc_b"]
    outs = []
    for e in range(n_experts):
        t = h @ params["net1_w"][e].T + params["net1_b"][e]
        t = jnp.maximum(t, 0.0)
        t = t @ params["net2_w"][e].T + params["net2_b"][e]
        outs.append(t)
    return jnp.concatenate(outs, axis=1)


if __name__ == "__main__":
    key = jax.random.PRNGKey(0)
    keys = jax.random.split(key, 8)

    scale = 0.25  # ~ torch Linear init range 1/sqrt(d_hid)
    params = {
        "pre_proc_w": jax.random.normal(keys[0], (D_HID, D_HID), jnp.float32) * scale,
        "pre_proc_b": jax.random.normal(keys[1], (D_HID,), jnp.float32) * scale,
        "net1_w": jax.random.normal(keys[2], (N_EXPERTS, D_HID, D_HID), jnp.float32) * scale,
        "net1_b": jax.random.normal(keys[3], (N_EXPERTS, D_HID), jnp.float32) * scale,
        "net2_w": jax.random.normal(keys[4], (N_EXPERTS, D_HID, D_HID), jnp.float32) * scale,
        "net2_b": jax.random.normal(keys[5], (N_EXPERTS, D_HID), jnp.float32) * scale,
    }
    x = jax.random.normal(keys[6], (BATCH, D_HID), jnp.float32)

    # Offline packing (done once; not part of the per-call critical path).
    slab, meta = pack_moe_params(params, N_EXPERTS)
    slab = jax.block_until_ready(slab)

    out = moe_forward(x, slab, meta)
    out = jax.block_until_ready(out)

    ref = _reference(x, params, N_EXPERTS)
    assert out.shape == (BATCH, D_HID * N_EXPERTS)
    assert jnp.allclose(out, ref, atol=1e-4, rtol=1e-4)

    print("KERNEL_OK")
</pallas_src>

<mosaic_0001>
module attributes {stable_mosaic.version = 11 : i64} {
  func.func @_moe_kernel(%arg0: memref<4x16xf32, #tpu.memory_space<vmem>>, %arg1: memref<160x128xf32, #tpu.memory_space<vmem>>, %arg2: memref<4x128xf32, #tpu.memory_space<vmem>>) attributes {dimension_semantics = [], scalar_prefetch = 0 : i64, scratch_operands = 0 : i64, tpu.core_type = #tpu.core_type<tc>} {
    %c0 = arith.constant 0 : index
    %c0_0 = arith.constant 0 : index
    %0 = vector.load %arg1[%c0, %c0_0] : memref<160x128xf32, #tpu.memory_space<vmem>>, vector<16x128xf32>
    %c16 = arith.constant 16 : index
    %c0_1 = arith.constant 0 : index
    %1 = vector.load %arg1[%c16, %c0_1] : memref<160x128xf32, #tpu.memory_space<vmem>>, vector<1x128xf32>
    %c24 = arith.constant 24 : index
    %c0_2 = arith.constant 0 : index
    %2 = vector.load %arg1[%c24, %c0_2] : memref<160x128xf32, #tpu.memory_space<vmem>>, vector<128x128xf32>
    %c152 = arith.constant 152 : index
    %c0_3 = arith.constant 0 : index
    %3 = vector.load %arg1[%c152, %c0_3] : memref<160x128xf32, #tpu.memory_space<vmem>>, vector<1x128xf32>
    %c0_4 = arith.constant 0 : index
    %c0_5 = arith.constant 0 : index
    %4 = vector.load %arg0[%c0_4, %c0_5] : memref<4x16xf32, #tpu.memory_space<vmem>>, vector<4x16xf32>
    %cst = arith.constant dense<0.000000e+00> : vector<4x128xf32>
    %5 = tpu.matmul %4, %0, %cst {dimension_numbers = #tpu.dot_dimension_numbers<[1], [0], [0], [1], [0, 0, 1, 1], [], []>} : vector<4x16xf32>, vector<16x128xf32>, vector<4x128xf32> -> vector<4x128xf32>
    %6 = vector.broadcast %1 : vector<1x128xf32> to vector<4x128xf32>
    %7 = arith.addf %5, %6 : vector<4x128xf32>
    %cst_6 = arith.constant 0.000000e+00 : f32
    %8 = vector.broadcast %cst_6 : f32 to vector<4x128xf32>
    %9 = arith.maximumf %7, %8 : vector<4x128xf32>
    %cst_7 = arith.constant dense<0.000000e+00> : vector<4x128xf32>
    %10 = tpu.matmul %9, %2, %cst_7 {dimension_numbers = #tpu.dot_dimension_numbers<[1], [0], [0], [1], [0, 0, 1, 1], [], []>} : vector<4x128xf32>, vector<128x128xf32>, vector<4x128xf32> -> vector<4x128xf32>
    %11 = vector.broadcast %3 : vector<1x128xf32> to vector<4x128xf32>
    %12 = arith.addf %10, %11 : vector<4x128xf32>
    %c0_8 = arith.constant 0 : index
    %c0_9 = arith.constant 0 : index
    %13 = vector.load %arg2[%c0_8, %c0_9] : memref<4x128xf32, #tpu.memory_space<vmem>>, vector<4x128xf32>
    tpu.vector_store %arg2[%c0_8, %c0_9], %12 {strides = array<i32>} : memref<4x128xf32, #tpu.memory_space<vmem>>, vector<4x128xf32>,
    return
  }
}

</mosaic_0001>

<bundles_post_ra>
// kernel: tpu_custom_call.1
= control target key start
LH: loop header
LB: loop body
LE: loop exit
PB: predicated region body
PF: predicated region fallthrough
CT: control target
= control target key end

     0   :  { %7 = vsyncpa [#allocation3], 0  ;;  %s244_s0 = inlined_call_operand.hbm [shape: f32[4,16], index: 0, kind: input, shape index: {}]   ;;  %s245_s1 = inlined_call_operand.hbm [shape: f32[160,128], index: 1, kind: input, shape index: {}]   ;;  %s246_s2 = inlined_call_operand.hbm [shape: f32[4,128], index: 2, kind: output, shape index: {}]  }
   0x1   :  { %8 = vsyncpa [#allocation6], 0 }
   0x2   :  { %9 = vsyncpa [#allocation4], 0  ;;  %s15_s11 = sshll.u32 %s244_s0, 4  ;;  %s215_s12 = smov [#allocation2]   ;;  %s16_s11 = int_to_ptr.hbm [resolvable:$true] %s15_s11 }
   0x3   :  { %s17_s13 = sshll.u32 %s215_s12, 4  ;;  %s25_s16 = sshll.u32 %s245_s1, 4  ;;  %s18_s13 = int_to_ptr.vmem [resolvable:$true] %s17_s13  ;;  %s26_s16 = int_to_ptr.hbm [resolvable:$true] %s25_s16 }
   0x4   :  { %20 = dma.hbm_to_vmem [thread:$0]  %s16_s11, 64, %s18_s13, [#allocation3]  }
   0x5   :  { %s216_s17 = smov [#allocation5]   ;;  %s217_s19 = smov 128  }
   0x6   :  { %s27_s18 = sshll.u32 %s216_s17, 4  ;;  %s218_s20 = smov 8   ;;  %s28_s18 = int_to_ptr.vmem [resolvable:$true] %s27_s18 }
   0x7   :  { %33 = dma.hbm_to_vmem [thread:$0]  %s26_s16, 2560, %s28_s18, [#allocation6], %s217_s19, %s217_s19, %s218_s20  }
   0x8   :  { %209 = dma.done.wait [#allocation3], 64  }
   0x9   :  { %210 = vsyncadd [#allocation3], 4294967232 }
   0xa   :  { %211 = dma.done.wait [#allocation6], 2560  }
   0xb   :  { %212 = vsyncadd [#allocation6], 4294964736  ;;  %v43_v0 = vld [vmem:[#allocation5 + $0x8] sm:$0xff]  ;;  %v42_v1 = vld [vmem:[#allocation5] sm:$0xff]  ;;  %vm64_vm0 = vcmask 130048   ;;  %s219_s0 = smov [#allocation7]  }
   0xc   :  { %82 = vmatpush.msra.mxu0 %v43_v0  ;;  %v62_v2 = vld [vmem:[#allocation2] sm:$0xf]  ;;  %v60_v3 = vld [vmem:[#allocation5 + $0x90] sm:$0xff]  ;;  %v59_v4 = vld [vmem:[#allocation5 + $0x88] sm:$0xff]  ;;  %s116_s1 = sshll.u32 %s219_s0, 4  ;;  %s118_s23 = sshll.u32 %s246_s2, 4  ;;  %s117_s1 = int_to_ptr.vmem [resolvable:$true] %s116_s1  ;;  %s119_s23 = int_to_ptr.hbm [resolvable:$true] %s118_s23 }
   0xd   :  { %90 = vmatpush.msra.mxu1 %v60_v3  ;;  %v58_v5 = vld [vmem:[#allocation5 + $0x80] sm:$0xff]  ;;  %v57_v6 = vld [vmem:[#allocation5 + $0x78] sm:$0xff]  ;;  %v56_v7 = vld [vmem:[#allocation5 + $0x70] sm:$0xff] }
   0xe   :  { %83 = vmatpush.msra.mxu0 %v42_v1  ;;  %v55_v8 = vld [vmem:[#allocation5 + $0x68] sm:$0xff]  ;;  %v54_v9 = vld [vmem:[#allocation5 + $0x60] sm:$0xff]  ;;  %v53_v10 = vld [vmem:[#allocation5 + $0x58] sm:$0xff] }
   0xf   :  { %129 = vmatmul.msk.f32.vlgmr.msra.gmra.mxu0 %vm64_vm0, %v62_v2  ;;  %91 = vmatpush.msra.mxu1 %v59_v4  ;;  %v52_v11 = vld [vmem:[#allocation5 + $0x50] sm:$0xff]  ;;  %v51_v12 = vld [vmem:[#allocation5 + $0x48] sm:$0xff]  ;;  %v50_v13 = vld [vmem:[#allocation5 + $0x40] sm:$0xff] }
  0x10   :  { %v49_v14 = vld [vmem:[#allocation5 + $0x38] sm:$0xff]  ;;  %v48_v15 = vld [vmem:[#allocation5 + $0x30] sm:$0xff]  ;;  %v47_v16 = vld [vmem:[#allocation5 + $0x28] sm:$0xff] }
  0x11   :  { %92 = vmatpush.msra.mxu1 %v58_v5  ;;  %v46_v17 = vld [vmem:[#allocation5 + $0x20] sm:$0xff]  ;;  %v45_v18 = vld [vmem:[#allocation5 + $0x18] sm:$0xff]  ;;  %v135_v19 = vld [vmem:[#allocation5 + $0x10] ss:$0 sm:$0xff] }
  0x12   :  { %v136_v23 = vld [vmem:[#allocation5 + $0x98] ss:$0 sm:$0xff] }
  0x13   :  { %93 = vmatpush.msra.mxu1 %v57_v6 }
  0x15   :  { %94 = vmatpush.msra.mxu1 %v56_v7 }
  0x17   :  { %95 = vmatpush.msra.mxu1 %v55_v8 }
  0x19   :  { %96 = vmatpush.msra.mxu1 %v54_v9 }
  0x1b   :  { %97 = vmatpush.msra.mxu1 %v53_v10 }
  0x1d   :  { %98 = vmatpush.msra.mxu1 %v52_v11 }
  0x1f   :  { %99 = vmatpush.msra.mxu1 %v51_v12 }
  0x21   :  { %100 = vmatpush.msra.mxu1 %v50_v13 }
  0x23   :  { %101 = vmatpush.msra.mxu1 %v49_v14 }
  0x25   :  { %102 = vmatpush.msra.mxu1 %v48_v15 }
  0x27   :  { %103 = vmatpush.msra.mxu1 %v47_v16 }
  0x29   :  { %104 = vmatpush.msra.mxu1 %v46_v17 }
  0x2b   :  { %105 = vmatpush.msra.mxu1 %v45_v18 }
  0x8c   :  { %v85_v20 = vpop.f32.mrf.mxu0 }
  0x8d   :  { %v86_v21 = vadd.f32 %v135_v19, %v85_v20 }
  0x8f   :  { %v88_v22 = vmax.f32 %v86_v21, 0.0 }
  0x91   :  { %106 = vmatmul.f32.vlgmr.msra.gmra.mxu1 %v88_v22 }
 0x10e   :  { %v107_v24 = vpop.f32.mrf.mxu1 }
 0x10f   :  { %v108_v25 = vadd.f32 %v136_v23, %v107_v24 }
 0x111   :  { %110 = vst [vmem:[#allocation7] sm:$0xf] %v108_v25 }
 0x112   :  { %121 = dma.vmem_to_hbm [thread:$0]  %s117_s1, 64, %s119_s23, [#allocation4]  }
 0x113   :  { %213 = dma.done.wait [#allocation4], 64  }
 0x114   :  { %214 = vsyncadd [#allocation4], 4294967232 }
 0x115   :  { %126 = vsyncpa [#allocation3], 1 }
 0x116   :  { %127 = vsyncpa [#allocation6], 1 }
 0x117   :  { %128 = vsyncpa [#allocation4], 1 }

</bundles_post_ra>
